<compile_context>
chip_gen: v5e
topology: v5e:2x2
jax: 0.10.0
libtpu: 0.0.40
codegen_flags: <defaults>
</compile_context>

<pallas_src>
import jax
import jax.numpy as jnp
from jax.experimental import pallas as pl
from jax.experimental.pallas import tpu as pltpu

_LANE = 128
_SUBLANE = 8


def _round_up(n, m):
    return ((n + m - 1) // m) * m


def _num_tensorcores():
    """Best-effort TensorCores-per-chip (v5e/v6e: 1, v7x: 2). Defaults to 1."""
    try:
        info = pltpu.get_tpu_info()
        for attr in ("num_cores", "num_tensorcores", "tensorcores_per_chip",
                     "cores_per_chip", "core_count"):
            v = getattr(info, attr, None)
            if v:
                return max(1, min(int(v), 4))
    except Exception:
        pass
    try:
        v = getattr(jax.devices()[0], "num_cores", None)
        if v:
            return max(1, min(int(v), 4))
    except Exception:
        pass
    return 1


def _mlp_kernel(x_ref, w1_ref, b1_ref, w2_ref, b2_ref, o_ref):
    """Fused 2-layer MLP tile: out = tanh(x @ W1 + b1) @ W2 + b2.

    x_ref : [block_b, D_in]   original input dtype (cast to MXU dtype in-kernel)
    w1_ref: [D_in, H]         matmul dtype (grid-resident)
    b1_ref: [1, H]            f32 (broadcasts over the batch/sublane axis)
    w2_ref: [H, D_out]        matmul dtype (grid-resident)
    b2_ref: [1, D_out]        f32
    o_ref : [block_b, D_out]  output dtype (unpadded; edge block masked by Pallas)
    """
    # In-kernel cast: x is read from HBM once in its original dtype; the VPU
    # cast to the MXU compute dtype happens on the already-resident VMEM tile.
    x = x_ref[...].astype(w1_ref.dtype)
    h = jnp.dot(x, w1_ref[...], preferred_element_type=jnp.float32)
    # Bias add + tanh stay in f32 (v5e's VPU/EUP have no bf16 path).
    h = jnp.tanh(h + b1_ref[...])
    # Back to the MXU compute dtype for layer 2; accumulation stays f32.
    h = h.astype(w2_ref.dtype)
    o = jnp.dot(h, w2_ref[...], preferred_element_type=jnp.float32)
    o_ref[...] = (o + b2_ref[...]).astype(o_ref.dtype)


def uncertainty_integrated_predictor_forward(x, w1, b1, w2, b2, *,
                                             block_b=None,
                                             compute_dtype=jnp.bfloat16,
                                             out_dtype=None):
    """Pallas implementation of UncertaintyIntegratedPredictor.forward
    (training path: base_model(x) with a 2-layer MLP base model).

    x  : [B, D_in]   float32
    w1 : [D_in, H]   float32
    b1 : [H]         float32
    w2 : [H, D_out]  float32
    b2 : [D_out]     float32
    compute_dtype : dtype of the MXU operands (default bf16); accumulation and
                    the bias/tanh path are always float32.
    out_dtype     : output dtype (default: x.dtype, matching the PyTorch module).
    returns [B, D_out]
    """
    B, D_in = x.shape
    H = w1.shape[1]
    D_out = w2.shape[1]
    out_dtype = jnp.dtype(x.dtype) if out_dtype is None else jnp.dtype(out_dtype)
    mm_dtype = (jnp.dtype(compute_dtype) if compute_dtype is not None
                else jnp.dtype(x.dtype))
    x_item = jnp.dtype(x.dtype).itemsize
    mm_item = mm_dtype.itemsize
    out_item = out_dtype.itemsize

    # Weights/biases are small and grid-resident: cast them once in the wrapper
    # (one-time, tiny); x itself is never copied/cast outside the kernel.
    w1_c = w1.astype(mm_dtype)
    w2_c = w2.astype(mm_dtype)
    b1_2d = b1.astype(jnp.float32).reshape(1, H)
    b2_2d = b2.astype(jnp.float32).reshape(1, D_out)

    # Residents are double-buffered by the default pipeliner (constant index_map).
    weight_bytes = 2 * ((D_in * H + H * D_out) * mm_item + (H + D_out) * 4)

    num_tc = _num_tensorcores()

    if block_b is None:
        cap = 2048  # big tiles amortize the ~0.35us/step overhead
        if num_tc > 1 and B >= 2 * num_tc * _SUBLANE:
            # Multi-TC chips (v7x): target >= 2 grid steps per core so the
            # x/out stream still double-buffers after megacore sharding.
            block_b = max(_SUBLANE, ((B // (2 * num_tc)) // _SUBLANE) * _SUBLANE)
            block_b = min(block_b, cap)
        else:
            # Single-TC chips (v5e/v6e): one big block; no forced split.
            block_b = min(cap, _round_up(B, _SUBLANE))
        # VMEM budget: everything that scales with block_b.
        per_row = (2 * D_in * x_item          # x stream (double-buffered)
                   + 2 * D_out * out_item     # out stream (double-buffered)
                   + D_in * mm_item           # in-kernel x cast
                   + H * 4 + H * mm_item      # h (f32) + its mm-dtype cast
                   + D_out * 4)               # o (f32) before the store cast
        budget = 12 * 1024 * 1024
        max_rows = max((budget - weight_bytes) // per_row, _SUBLANE)
        max_rows = (max_rows // _SUBLANE) * _SUBLANE
        block_b = max(min(block_b, max_rows), _SUBLANE)
    else:
        block_b = max(int(block_b), 1)
        if block_b < B:
            block_b = _round_up(block_b, _SUBLANE)

    grid_steps = pl.cdiv(B, block_b)
    if grid_steps == 1:
        # A single full-array block is always layout-legal (second-minor dim
        # equals the full batch dim), avoids any padding/masking entirely.
        block_b = B
        grid_steps = 1

    # vmem_limit: stream/weight terms already include the x2 double-buffer
    # factor (no second x2), plus in-kernel intermediates and 2 MiB headroom
    # for Mosaic scratch.  Clamped to 32 MiB (v7x scoped-default safe).
    stream_bytes = block_b * (2 * D_in * x_item + 2 * D_out * out_item)
    scratch_bytes = block_b * (D_in * mm_item + H * 4 + H * mm_item + D_out * 4)
    vmem_limit = int(min(max(stream_bytes + weight_bytes + scratch_bytes + (2 << 20),
                             16 * 1024 * 1024),
                         32 * 1024 * 1024))

    cost = pl.CostEstimate(
        flops=int(2 * B * (D_in * H + H * D_out)),
        transcendentals=int(B * H),
        bytes_accessed=int(B * D_in * x_item + B * D_out * out_item
                           + (D_in * H + H * D_out) * mm_item + (H + D_out) * 4),
    )

    # TODO(synk): for production-sized weights on v7x (64 MiB VMEM), single-buffer
    # the resident W1/b1/W2/b2 specs (pipeline_mode=pl.Buffered(1)) or add an
    # "arbitrary" reduction axis that streams W1 tiles into a VMEM accumulator.
    out = pl.pallas_call(
        _mlp_kernel,
        out_shape=jax.ShapeDtypeStruct((B, D_out), out_dtype),
        grid_spec=pltpu.PrefetchScalarGridSpec(
            num_scalar_prefetch=0,
            grid=(grid_steps,),
            in_specs=[
                pl.BlockSpec((block_b, D_in), lambda i: (i, 0)),  # x tile (streams)
                pl.BlockSpec((D_in, H), lambda i: (0, 0)),        # W1 (resident)
                pl.BlockSpec((1, H), lambda i: (0, 0)),           # b1 (resident)
                pl.BlockSpec((H, D_out), lambda i: (0, 0)),       # W2 (resident)
                pl.BlockSpec((1, D_out), lambda i: (0, 0)),       # b2 (resident)
            ],
            out_specs=pl.BlockSpec((block_b, D_out), lambda i: (i, 0)),
        ),
        compiler_params=pltpu.CompilerParams(
            dimension_semantics=("parallel",),
            vmem_limit_bytes=vmem_limit,
        ),
        cost_estimate=cost,
    )(x, w1_c, b1_2d, w2_c, b2_2d)
    return out


def _reference_forward(x, w1, b1, w2, b2, compute_dtype=None, out_dtype=None):
    dt = (jnp.dtype(compute_dtype) if compute_dtype is not None
          else jnp.dtype(x.dtype))
    od = jnp.dtype(x.dtype) if out_dtype is None else jnp.dtype(out_dtype)
    h = jnp.dot(x.astype(dt), w1.astype(dt), preferred_element_type=jnp.float32)
    h = jnp.tanh(h + b1.astype(jnp.float32))
    o = jnp.dot(h.astype(dt), w2.astype(dt), preferred_element_type=jnp.float32)
    return (o + b2.astype(jnp.float32)).astype(od)


if __name__ == "__main__":
    # Small deterministic shapes consistent with the module's [batch, input_dim]
    # contract: batch=2, input_dim=32, hidden=64, output_dim=8.
    B, D_IN, HID, D_OUT = 2, 32, 64, 8

    key = jax.random.PRNGKey(0)
    k_x, k_w1, k_b1, k_w2, k_b2, k_x2 = jax.random.split(key, 6)

    x = jax.random.normal(k_x, (B, D_IN), dtype=jnp.float32)
    # Deterministic synthetic parameters for the base model (no checkpoint load).
    w1 = jax.random.normal(k_w1, (D_IN, HID), dtype=jnp.float32) * 0.1
    b1 = jax.random.normal(k_b1, (HID,), dtype=jnp.float32) * 0.01
    w2 = jax.random.normal(k_w2, (HID, D_OUT), dtype=jnp.float32) * 0.1
    b2 = jax.random.normal(k_b2, (D_OUT,), dtype=jnp.float32) * 0.01

    # 1) f32 MXU path at the module's tiny demo shape: one full-array block
    #    (block_b == B == 2), no padding anywhere, unpadded (B, D_out) output.
    out = jax.block_until_ready(
        uncertainty_integrated_predictor_forward(
            x, w1, b1, w2, b2, compute_dtype=jnp.float32))
    ref = _reference_forward(x, w1, b1, w2, b2)
    assert out.shape == (B, D_OUT)
    assert jnp.allclose(out, ref, atol=1e-5, rtol=1e-5), "f32 mismatch vs reference"

    # 2) Multi-block grid with a non-divisible batch (exercises the pipelined
    #    x/out stream and Pallas edge-block masking on writeback; rows are
    #    independent so the garbage rows of the last partial tile are dropped).
    B2 = 300
    x2 = jax.random.normal(k_x2, (B2, D_IN), dtype=jnp.float32)
    out2 = jax.block_until_ready(
        uncertainty_integrated_predictor_forward(
            x2, w1, b1, w2, b2, compute_dtype=jnp.float32, block_b=128))
    ref2 = _reference_forward(x2, w1, b1, w2, b2)
    assert out2.shape == (B2, D_OUT)
    assert jnp.allclose(out2, ref2, atol=1e-5, rtol=1e-5), "f32 tiled mismatch"

    # 3) Production default: bf16 MXU operands (cast in-kernel, f32 accumulation,
    #    f32 bias/tanh), auto block-size heuristic, f32 output.
    out_bf = jax.block_until_ready(
        uncertainty_integrated_predictor_forward(x2, w1, b1, w2, b2))
    ref_bf = _reference_forward(x2, w1, b1, w2, b2, compute_dtype=jnp.bfloat16)
    assert out_bf.shape == (B2, D_OUT)
    assert jnp.allclose(out_bf, ref_bf, atol=2e-2, rtol=2e-2), "bf16 mismatch"

    print("KERNEL_OK")
</pallas_src>

<mosaic_0001>
module attributes {stable_mosaic.version = 11 : i64} {
  func.func @_mlp_kernel(%arg0: i32, %arg1: memref<2x32xf32, #tpu.memory_space<vmem>>, %arg2: memref<32x64xf32, #tpu.memory_space<vmem>>, %arg3: memref<1x64xf32, #tpu.memory_space<vmem>>, %arg4: memref<64x8xf32, #tpu.memory_space<vmem>>, %arg5: memref<1x8xf32, #tpu.memory_space<vmem>>, %arg6: memref<2x8xf32, #tpu.memory_space<vmem>>) attributes {dimension_semantics = [#tpu.dimension_semantics<parallel>], iteration_bounds = array<i64: 1>, scalar_prefetch = 0 : i64, scratch_operands = 0 : i64, tpu.core_type = #tpu.core_type<tc>, window_params = [{transform_indices = @transform_0, window_bounds = array<i64: 2, 32>}, {pipeline_mode = #tpu.pipeline_mode<synchronous>, transform_indices = @transform_1, window_bounds = array<i64: 32, 64>}, {pipeline_mode = #tpu.pipeline_mode<synchronous>, transform_indices = @transform_2, window_bounds = array<i64: 1, 64>}, {pipeline_mode = #tpu.pipeline_mode<synchronous>, transform_indices = @transform_3, window_bounds = array<i64: 64, 8>}, {pipeline_mode = #tpu.pipeline_mode<synchronous>, transform_indices = @transform_4, window_bounds = array<i64: 1, 8>}, {transform_indices = @transform_5, window_bounds = array<i64: 2, 8>}]} {
    %c0 = arith.constant 0 : index
    %c0_0 = arith.constant 0 : index
    %0 = vector.load %arg1[%c0, %c0_0] : memref<2x32xf32, #tpu.memory_space<vmem>>, vector<2x32xf32>
    %c0_1 = arith.constant 0 : index
    %c0_2 = arith.constant 0 : index
    %1 = vector.load %arg2[%c0_1, %c0_2] : memref<32x64xf32, #tpu.memory_space<vmem>>, vector<32x64xf32>
    %cst = arith.constant dense<0.000000e+00> : vector<2x64xf32>
    %2 = tpu.matmul %0, %1, %cst {dimension_numbers = #tpu.dot_dimension_numbers<[1], [0], [0], [1], [0, 0, 1, 1], [], []>} : vector<2x32xf32>, vector<32x64xf32>, vector<2x64xf32> -> vector<2x64xf32>
    %c0_3 = arith.constant 0 : index
    %c0_4 = arith.constant 0 : index
    %3 = vector.load %arg3[%c0_3, %c0_4] : memref<1x64xf32, #tpu.memory_space<vmem>>, vector<1x64xf32>
    %4 = vector.broadcast %3 : vector<1x64xf32> to vector<2x64xf32>
    %5 = arith.addf %2, %4 : vector<2x64xf32>
    %6 = math.tanh %5 : vector<2x64xf32>
    %c0_5 = arith.constant 0 : index
    %c0_6 = arith.constant 0 : index
    %7 = vector.load %arg4[%c0_5, %c0_6] : memref<64x8xf32, #tpu.memory_space<vmem>>, vector<64x8xf32>
    %cst_7 = arith.constant dense<0.000000e+00> : vector<2x8xf32>
    %8 = tpu.matmul %6, %7, %cst_7 {dimension_numbers = #tpu.dot_dimension_numbers<[1], [0], [0], [1], [0, 0, 1, 1], [], []>} : vector<2x64xf32>, vector<64x8xf32>, vector<2x8xf32> -> vector<2x8xf32>
    %c0_8 = arith.constant 0 : index
    %c0_9 = arith.constant 0 : index
    %9 = vector.load %arg5[%c0_8, %c0_9] : memref<1x8xf32, #tpu.memory_space<vmem>>, vector<1x8xf32>
    %10 = vector.broadcast %9 : vector<1x8xf32> to vector<2x8xf32>
    %11 = arith.addf %8, %10 : vector<2x8xf32>
    %c0_10 = arith.constant 0 : index
    %c0_11 = arith.constant 0 : index
    %12 = vector.load %arg6[%c0_10, %c0_11] : memref<2x8xf32, #tpu.memory_space<vmem>>, vector<2x8xf32>
    tpu.vector_store %arg6[%c0_10, %c0_11], %11 {strides = array<i32>} : memref<2x8xf32, #tpu.memory_space<vmem>>, vector<2x8xf32>,
    return
  }
  func.func @transform_0(%arg0: i32) -> (i32, i32) {
    %c0_i32 = arith.constant 0 : i32
    %c0_i32_0 = arith.constant 0 : i32
    return %arg0, %c0_i32 : i32, i32
  }
  func.func @transform_1(%arg0: i32) -> (i32, i32) {
    %c0_i32 = arith.constant 0 : i32
    %c0_i32_0 = arith.constant 0 : i32
    %c0_i32_1 = arith.constant 0 : i32
    return %c0_i32, %c0_i32_0 : i32, i32
  }
  func.func @transform_2(%arg0: i32) -> (i32, i32) {
    %c0_i32 = arith.constant 0 : i32
    %c0_i32_0 = arith.constant 0 : i32
    %c0_i32_1 = arith.constant 0 : i32
    return %c0_i32, %c0_i32_0 : i32, i32
  }
  func.func @transform_3(%arg0: i32) -> (i32, i32) {
    %c0_i32 = arith.constant 0 : i32
    %c0_i32_0 = arith.constant 0 : i32
    %c0_i32_1 = arith.constant 0 : i32
    return %c0_i32, %c0_i32_0 : i32, i32
  }
  func.func @transform_4(%arg0: i32) -> (i32, i32) {
    %c0_i32 = arith.constant 0 : i32
    %c0_i32_0 = arith.constant 0 : i32
    %c0_i32_1 = arith.constant 0 : i32
    return %c0_i32, %c0_i32_0 : i32, i32
  }
  func.func @transform_5(%arg0: i32) -> (i32, i32) {
    %c0_i32 = arith.constant 0 : i32
    %c0_i32_0 = arith.constant 0 : i32
    return %arg0, %c0_i32 : i32, i32
  }
}

</mosaic_0001>

<bundles_post_ra>
// kernel: tpu_custom_call.1
= control target key start
LH: loop header
LB: loop body
LE: loop exit
PB: predicated region body
PF: predicated region fallthrough
CT: control target
= control target key end

     0   :  { %s221_s0 = inlined_call_operand.vmem [shape: f32[2,32], index: 0, kind: input, shape index: {}]   ;;  %s222_s1 = inlined_call_operand.vmem [shape: f32[32,64], index: 1, kind: input, shape index: {}]   ;;  %s223_s2 = inlined_call_operand.vmem [shape: f32[1,64], index: 2, kind: input, shape index: {}]   ;;  %s224_s3 = inlined_call_operand.vmem [shape: f32[64,8], index: 3, kind: input, shape index: {}]   ;;  %s225_s4 = inlined_call_operand.vmem [shape: f32[1,8], index: 4, kind: input, shape index: {}]   ;;  %s226_s5 = inlined_call_operand.hbm [shape: f32[2,8], index: 5, kind: output, shape index: {}]  }
   0x1   :  { %v25_v0 = vld [vmem:[%s222_s1 + $0x18] sm:$0xff]  ;;  %v24_v1 = vld [vmem:[%s222_s1 + $0x10] sm:$0xff]  ;;  %v23_v3 = vld [vmem:[%s222_s1 + $0x8] sm:$0xff] }
   0x2   :  { %46 = vmatpush.msra.mxu0 %v25_v0  ;;  %v62_v2 = vld [vmem:[%s224_s3 + $0x38] sm:$0xff]  ;;  %v61_v4 = vld [vmem:[%s224_s3 + $0x30] sm:$0xff]  ;;  %v60_v5 = vld [vmem:[%s224_s3 + $0x28] sm:$0xff] }
   0x3   :  { %79 = vmatpush.msra.mxu1 %v62_v2 }
   0x4   :  { %47 = vmatpush.msra.mxu0 %v24_v1 }
   0x5   :  { %10 = vsyncpa [#allocation3], 0  ;;  %v22_v6 = vld [vmem:[%s222_s1] sm:$0xff]  ;;  %80 = vmatpush.msra.mxu1 %v61_v4  ;;  %vm30_vm0 = vcmask 261120   ;;  %v58_v9 = vld [vmem:[%s224_s3 + $0x18] sm:$0xff]  ;;  %vm67_vm1 = vcmask 523264  }
   0x6   :  { %48 = vmatpush.msra.mxu0 %v23_v3  ;;  %v21_v7 = vld [vmem:[%s221_s0] sm:$0x3]  ;;  %v57_v10 = vld [vmem:[%s224_s3 + $0x10] sm:$0xff]  ;;  %v56_v11 = vld [vmem:[%s224_s3 + $0x8] sm:$0xff]  ;;  %s142_s21 = smov [#allocation2]   ;;  %s100_s24 = sshll.u32 %s226_s5, 4  ;;  %s101_s24 = int_to_ptr.hbm [resolvable:$true] %s100_s24 }
   0x7   :  { %81 = vmatpush.msra.mxu1 %v60_v5  ;;  %v59_v8 = vld [vmem:[%s224_s3 + $0x20] sm:$0xff]  ;;  %s98_s22 = sshll.u32 %s142_s21, 4  ;;  %vm91_vm2 = vcmask 58368   ;;  %s99_s22 = int_to_ptr.vmem [resolvable:$true] %s98_s22 }
   0x8   :  { %49 = vmatpush.msra.mxu0 %v22_v6  ;;  %v55_v12 = vld [vmem:[%s224_s3] sm:$0xff] }
   0x9   :  { %109 = vmatmul.msk.f32.vlgmr.msra.gmra.mxu0 %vm30_vm0, %v21_v7  ;;  %82 = vmatpush.msra.mxu1 %v59_v8  ;;  %v112_v13 = vld [vmem:[%s223_s2] ss:$0 sm:$0xff] }
   0xa   :  { %v113_v17 = vld [vmem:[%s225_s4] ss:$0 sm:$0xff] }
   0xb   :  { %83 = vmatpush.msra.mxu1 %v58_v9 }
   0xd   :  { %84 = vmatpush.msra.mxu1 %v57_v10 }
   0xf   :  { %85 = vmatpush.msra.mxu1 %v56_v11 }
  0x11   :  { %86 = vmatpush.msra.mxu1 %v55_v12 }
  0x86   :  { %v51_v14 = vpop.f32.mrf.mxu0 }
  0x87   :  { %v52_v15 = vadd.f32 %v112_v13, %v51_v14 }
  0x89   :  { %114 = vtanh.f32 %v52_v15 }
  0x8f   :  { %v115_v16 = vpop.eup %114 }
  0x90   :  { %110 = vmatmul.msk.f32.vlgmr.msra.gmra.mxu1 %vm67_vm1, %v115_v16 }
 0x10d   :  { %v88_v18 = vpop.f32.mrf.mxu1 }
 0x10e   :  { %v89_v19 = vadd.f32 %v113_v17, %v88_v18 }
 0x110   :  { %92 = vst.msk [vmem:[#allocation2] sm:$0x3] %vm91_vm2, %v89_v19 }
 0x111   :  { %103 = dma.vmem_to_hbm [thread:$0]  %s99_s22, 32, %s101_s24, [#allocation3]  }
 0x112   :  { %140 = dma.done.wait [#allocation3], 32  }
 0x113   :  { %141 = vsyncadd [#allocation3], 4294967264 }
 0x114   :  { %108 = vsyncpa [#allocation3], 1 }

</bundles_post_ra>
